<compile_context>
chip_gen: v7x
topology: tpu7x:2x2x1
jax: 0.10.0
libtpu: 0.0.40
codegen_flags: <defaults>
</compile_context>

<pallas_src>
import functools

import jax
import jax.numpy as jnp
from jax import lax
from jax.experimental import pallas as pl
from jax.experimental.pallas import tpu as pltpu


# Tables at or below this size take the resident-in-VMEM fast path.
_RESIDENT_TABLE_MAX_BYTES = 4 * 1024 * 1024
# Inner unroll width for the DMA-descriptor issue loop (general path).
_ISSUE_UNROLL = 8


def _vmem_limit(budget_bytes):
    """Scoped-VMEM request: leave the default for small kernels, else ask for what we
    need (+4 MiB headroom), capped well under v7x's 64 MiB physical VMEM."""
    need = int(budget_bytes) + (4 << 20)
    if need <= (16 << 20):
        return None
    return min(need, 48 << 20)


def _resident_kernel(ids_vec_ref, mod_ids_ref, mod_emb_ref, emb_ref, out_ref, *, num_mods):
    """Small-vocab path: table resident in VMEM, gather = one-hot @ table on the MXU."""
    ids_vec = ids_vec_ref[...]                               # (TOK, 1) int32
    tok = ids_vec.shape[0]
    vocab = emb_ref.shape[0]

    col = lax.broadcasted_iota(jnp.int32, (tok, vocab), 1)   # (TOK, V)
    onehot = (col == ids_vec).astype(emb_ref.dtype)          # exact 0/1 rows
    tile = jnp.dot(onehot, emb_ref[...], preferred_element_type=jnp.float32)

    # Vectorized overrides; static unroll over the small modification table,
    # later entries win (matches dict-iteration order of the torch module).
    for m in range(num_mods):
        hit = ids_vec == mod_ids_ref[m]                      # (TOK, 1) bool
        tile = jnp.where(hit, mod_emb_ref[m, :][None, :].astype(tile.dtype), tile)

    out_ref[...] = tile.astype(out_ref.dtype)


def _gather_kernel(ids_smem, ids_vec_ref, mod_ids_ref, mod_emb_ref, emb_hbm_ref,
                   out_ref, dma_sem, *, tok_block, num_mods):
    """General path: per-row HBM gather DMAs straight into the output block."""
    i = pl.program_id(0)
    base = pl.multiple_of(i * tok_block, tok_block)

    # (1) Issue every row-gather DMA for this block; all stay in flight together.
    #     8-wide unroll so the scheduler can pack SMEM id reads + address math +
    #     dma_start of neighbouring rows into shared scalar/misc slots.
    n_outer = tok_block // _ISSUE_UNROLL

    @pl.loop(0, n_outer)
    def _issue(s):
        t0 = pl.multiple_of(s * _ISSUE_UNROLL, _ISSUE_UNROLL)
        for u in range(_ISSUE_UNROLL):
            t = t0 + u
            row = ids_smem[base + t]                         # scalar token id
            pltpu.make_async_copy(emb_hbm_ref.at[row], out_ref.at[t], dma_sem).start()

    # (2) Single drain: every row copy signalled the same DMA semaphore, so one wait
    #     whose descriptor spans the whole (TOK, D) tile consumes exactly the
    #     accumulated byte count (completion order irrelevant).
    pltpu.make_async_copy(out_ref, out_ref, dma_sem).wait()

    # (3) Override pass, skipped for blocks containing no modified tokens: the cheap
    #     (TOK,1) id compares decide; the (TOK,D) load/where/store only runs on a hit.
    if num_mods > 0:
        ids_vec = ids_vec_ref[...]                           # (TOK, 1) int32
        hits = [ids_vec == mod_ids_ref[m] for m in range(num_mods)]
        any_hit = hits[0]
        for m in range(1, num_mods):
            any_hit = jnp.logical_or(any_hit, hits[m])
        block_has_hit = jnp.sum(any_hit.astype(jnp.int32)) > 0

        @pl.when(block_has_hit)
        def _():
            tile = out_ref[...]
            for m in range(num_mods):
                tile = jnp.where(hits[m], mod_emb_ref[m, :][None, :], tile)
            out_ref[...] = tile


@functools.partial(jax.jit, static_argnames=("tok_block", "force_hbm_gather"))
def custom_embedding(input_ids, emb_table, mod_ids, mod_embs, *,
                     tok_block=256, force_hbm_gather=False):
    """input_ids: (B, S) int; emb_table: (V, D); mod_ids: (M,) int; mod_embs: (M, D)."""
    B, S = input_ids.shape
    V, D = emb_table.shape
    M = int(mod_ids.shape[0])
    N = B * S
    esize = jnp.dtype(emb_table.dtype).itemsize

    assert tok_block % _ISSUE_UNROLL == 0
    n_blocks = pl.cdiv(N, tok_block)
    n_pad = n_blocks * tok_block

    flat_ids = input_ids.reshape(N).astype(jnp.int32)
    # Pad to whole token blocks. Pad id 0 assumes row 0 is a valid in-range row;
    # padded results are sliced off afterwards.
    flat_ids = jnp.pad(flat_ids, (0, n_pad - N))
    ids_vec = flat_ids.reshape(n_pad, 1)

    if M > 0:
        mod_ids_arr = mod_ids.astype(jnp.int32)
        mod_embs_arr = mod_embs.astype(emb_table.dtype)      # avoid silent promote/downcast
    else:
        mod_ids_arr = jnp.full((1,), -1, jnp.int32)          # placeholders, never read
        mod_embs_arr = jnp.zeros((1, D), emb_table.dtype)

    use_resident = (not force_hbm_gather) and (V * D * esize <= _RESIDENT_TABLE_MAX_BYTES)

    if use_resident:
        # ---- Fast path: table resident in VMEM, one-hot MXU gather, no DMAs. ----
        v_pad = ((V + 127) // 128) * 128                     # lane-align the contraction dim
        table = jnp.pad(emb_table, ((0, v_pad - V), (0, 0)))
        budget = (2 * tok_block * D * esize                  # out, double-buffered
                  + 2 * tok_block * 4                        # ids_vec
                  + 2 * mod_embs_arr.shape[0] * D * esize    # mod embeddings
                  + 2 * v_pad * D * esize                    # resident table
                  + tok_block * v_pad * 4                    # one-hot temp
                  + tok_block * D * 4)                       # f32 accumulator tile
        kernel = functools.partial(_resident_kernel, num_mods=M)
        out_flat = pl.pallas_call(
            kernel,
            out_shape=jax.ShapeDtypeStruct((n_pad, D), emb_table.dtype),
            grid_spec=pltpu.PrefetchScalarGridSpec(
                num_scalar_prefetch=0,
                grid=(n_blocks,),
                in_specs=[
                    pl.BlockSpec((tok_block, 1), lambda i: (i, 0)),
                    pl.BlockSpec(memory_space=pltpu.MemorySpace.SMEM),
                    pl.BlockSpec(mod_embs_arr.shape, lambda i: (0, 0)),
                    pl.BlockSpec((v_pad, D), lambda i: (0, 0)),   # fetched once, reused
                ],
                out_specs=pl.BlockSpec((tok_block, D), lambda i: (i, 0)),
            ),
            compiler_params=pltpu.CompilerParams(
                dimension_semantics=("parallel",),
                vmem_limit_bytes=_vmem_limit(budget),
            ),
        )(ids_vec, mod_ids_arr, mod_embs_arr, table)
    else:
        # ---- General path: table in HBM, manual row-gather DMAs into out_ref. ----
        budget = (2 * tok_block * D * esize                  # out, double-buffered
                  + 2 * tok_block * 4                        # ids_vec
                  + 2 * mod_embs_arr.shape[0] * D * esize    # mod embeddings
                  + tok_block * D * esize)                   # override tile temp
        kernel = functools.partial(_gather_kernel, tok_block=tok_block, num_mods=M)
        out_flat = pl.pallas_call(
            kernel,
            out_shape=jax.ShapeDtypeStruct((n_pad, D), emb_table.dtype),
            grid_spec=pltpu.PrefetchScalarGridSpec(
                num_scalar_prefetch=1,                       # flat ids -> SMEM (DMA addressing)
                grid=(n_blocks,),
                in_specs=[
                    pl.BlockSpec((tok_block, 1), lambda i, ids: (i, 0)),
                    pl.BlockSpec(memory_space=pltpu.MemorySpace.SMEM),
                    pl.BlockSpec(mod_embs_arr.shape, lambda i, ids: (0, 0)),
                    pl.BlockSpec(memory_space=pl.ANY),       # table left in HBM
                ],
                out_specs=pl.BlockSpec((tok_block, D), lambda i, ids: (i, 0)),
                scratch_shapes=[pltpu.SemaphoreType.DMA],
            ),
            compiler_params=pltpu.CompilerParams(
                dimension_semantics=("parallel",),
                vmem_limit_bytes=_vmem_limit(budget),
            ),
        )(flat_ids, ids_vec, mod_ids_arr, mod_embs_arr, emb_table)

    return out_flat[:N].reshape(B, S, D)


if __name__ == "__main__":
    # Small deterministic setup consistent with the module:
    #   vocab V=64, hidden D=128, batch B=2, seq S=8, M=2 modifications.
    key = jax.random.PRNGKey(0)
    k_emb, k_ids, k_mod = jax.random.split(key, 3)

    V, D = 64, 128
    B, S = 2, 8
    M = 2

    emb_table = jax.random.normal(k_emb, (V, D), dtype=jnp.float32)
    input_ids = jax.random.randint(k_ids, (B, S), 0, V, dtype=jnp.int32)

    # Deterministic "add_modification" calls: override token ids with new vectors.
    mod_ids = jnp.array([int(input_ids[0, 0]), int(input_ids[1, 3])], dtype=jnp.int32)
    mod_embs = jax.random.normal(k_mod, (M, D), dtype=jnp.float32)

    # Pure-JAX reference (lookup + masked overwrite, later modifications win).
    ref = emb_table[input_ids]
    for m in range(M):
        mask = (input_ids == mod_ids[m])[..., None]
        ref = jnp.where(mask, mod_embs[m][None, None, :], ref)

    # Fast path (table resident in VMEM, one-hot MXU gather) — default for V*D=32 KB.
    out_fast = jax.block_until_ready(
        custom_embedding(input_ids, emb_table, mod_ids, mod_embs))
    assert out_fast.shape == (B, S, D), out_fast.shape
    assert jnp.allclose(out_fast, ref, atol=1e-6), "resident-path mismatch vs reference"

    # General path (table in HBM, manual row-gather DMAs into the output block).
    out_gather = jax.block_until_ready(
        custom_embedding(input_ids, emb_table, mod_ids, mod_embs, force_hbm_gather=True))
    assert out_gather.shape == (B, S, D), out_gather.shape
    assert jnp.allclose(out_gather, ref, atol=1e-6), "gather-path mismatch vs reference"

    print("KERNEL_OK")
</pallas_src>

<mosaic_0001>
module attributes {stable_mosaic.version = 11 : i64} {
  func.func @_resident_kernel(%arg0: i32, %arg1: memref<256x1xi32, #tpu.memory_space<vmem>>, %arg2: memref<2xi32, #tpu.memory_space<smem>>, %arg3: memref<2x128xf32, #tpu.memory_space<vmem>>, %arg4: memref<128x128xf32, #tpu.memory_space<vmem>>, %arg5: memref<256x128xf32, #tpu.memory_space<vmem>>) attributes {dimension_semantics = [#tpu.dimension_semantics<parallel>], iteration_bounds = array<i64: 1>, scalar_prefetch = 0 : i64, scratch_operands = 0 : i64, tpu.core_type = #tpu.core_type<tc>, window_params = [{transform_indices = @transform_0, window_bounds = array<i64: 256, 1>}, {transform_indices = @transform_1, window_bounds = array<i64: 2>}, {pipeline_mode = #tpu.pipeline_mode<synchronous>, transform_indices = @transform_2, window_bounds = array<i64: 2, 128>}, {pipeline_mode = #tpu.pipeline_mode<synchronous>, transform_indices = @transform_3, window_bounds = array<i64: 128, 128>}, {transform_indices = @transform_4, window_bounds = array<i64: 256, 128>}]} {
    %c0 = arith.constant 0 : index
    %c0_0 = arith.constant 0 : index
    %0 = vector.load %arg1[%c0, %c0_0] : memref<256x1xi32, #tpu.memory_space<vmem>>, vector<256x1xi32>
    %1 = tpu.iota {dimensions = array<i32: 1>} : vector<256x128xi32>
    %2 = vector.broadcast %0 : vector<256x1xi32> to vector<256x128xi32>
    %3 = arith.cmpi eq, %1, %2 : vector<256x128xi32>
    %4 = arith.extui %3 : vector<256x128xi1> to vector<256x128xi32>
    %5 = arith.sitofp %4 : vector<256x128xi32> to vector<256x128xf32>
    %c0_1 = arith.constant 0 : index
    %c0_2 = arith.constant 0 : index
    %6 = vector.load %arg4[%c0_1, %c0_2] : memref<128x128xf32, #tpu.memory_space<vmem>>, vector<128x128xf32>
    %cst = arith.constant dense<0.000000e+00> : vector<256x128xf32>
    %7 = tpu.matmul %5, %6, %cst {dimension_numbers = #tpu.dot_dimension_numbers<[1], [0], [0], [1], [0, 0, 1, 1], [], []>} : vector<256x128xf32>, vector<128x128xf32>, vector<256x128xf32> -> vector<256x128xf32>
    %c0_3 = arith.constant 0 : index
    %8 = memref.load %arg2[%c0_3] : memref<2xi32, #tpu.memory_space<smem>>
    %9 = vector.broadcast %8 : i32 to vector<256x1xi32>
    %10 = arith.cmpi eq, %0, %9 : vector<256x1xi32>
    %c0_4 = arith.constant 0 : index
    %c0_5 = arith.constant 0 : index
    %11 = vector.load %arg3[%c0_4, %c0_5] : memref<2x128xf32, #tpu.memory_space<vmem>>, vector<1x128xf32>
    %12 = vector.shape_cast %11 : vector<1x128xf32> to vector<128xf32>
    %13 = vector.shape_cast %12 : vector<128xf32> to vector<1x128xf32>
    %14 = vector.shape_cast %10 : vector<256x1xi1> to vector<256x1xi1>
    %15 = vector.broadcast %14 : vector<256x1xi1> to vector<256x128xi1>
    %16 = vector.shape_cast %13 : vector<1x128xf32> to vector<1x128xf32>
    %17 = vector.broadcast %16 : vector<1x128xf32> to vector<256x128xf32>
    %18 = arith.select %15, %17, %7 : vector<256x128xi1>, vector<256x128xf32>
    %c1 = arith.constant 1 : index
    %19 = memref.load %arg2[%c1] : memref<2xi32, #tpu.memory_space<smem>>
    %20 = vector.broadcast %19 : i32 to vector<256x1xi32>
    %21 = arith.cmpi eq, %0, %20 : vector<256x1xi32>
    %c1_6 = arith.constant 1 : index
    %c0_7 = arith.constant 0 : index
    %22 = vector.load %arg3[%c1_6, %c0_7] : memref<2x128xf32, #tpu.memory_space<vmem>>, vector<1x128xf32>
    %23 = vector.shape_cast %22 : vector<1x128xf32> to vector<128xf32>
    %24 = vector.shape_cast %23 : vector<128xf32> to vector<1x128xf32>
    %25 = vector.shape_cast %21 : vector<256x1xi1> to vector<256x1xi1>
    %26 = vector.broadcast %25 : vector<256x1xi1> to vector<256x128xi1>
    %27 = vector.shape_cast %24 : vector<1x128xf32> to vector<1x128xf32>
    %28 = vector.broadcast %27 : vector<1x128xf32> to vector<256x128xf32>
    %29 = arith.select %26, %28, %18 : vector<256x128xi1>, vector<256x128xf32>
    %c0_8 = arith.constant 0 : index
    %c0_9 = arith.constant 0 : index
    %30 = vector.load %arg5[%c0_8, %c0_9] : memref<256x128xf32, #tpu.memory_space<vmem>>, vector<256x128xf32>
    tpu.vector_store %arg5[%c0_8, %c0_9], %29 {strides = array<i32>} : memref<256x128xf32, #tpu.memory_space<vmem>>, vector<256x128xf32>,
    return
  }
  func.func @transform_0(%arg0: i32) -> (i32, i32) {
    %c0_i32 = arith.constant 0 : i32
    %c0_i32_0 = arith.constant 0 : i32
    return %arg0, %c0_i32 : i32, i32
  }
  func.func @transform_1(%arg0: i32) -> i32 {
    %c0_i32 = arith.constant 0 : i32
    %c0_i32_0 = arith.constant 0 : i32
    return %c0_i32 : i32
  }
  func.func @transform_2(%arg0: i32) -> (i32, i32) {
    %c0_i32 = arith.constant 0 : i32
    %c0_i32_0 = arith.constant 0 : i32
    %c0_i32_1 = arith.constant 0 : i32
    return %c0_i32, %c0_i32_0 : i32, i32
  }
  func.func @transform_3(%arg0: i32) -> (i32, i32) {
    %c0_i32 = arith.constant 0 : i32
    %c0_i32_0 = arith.constant 0 : i32
    %c0_i32_1 = arith.constant 0 : i32
    return %c0_i32, %c0_i32_0 : i32, i32
  }
  func.func @transform_4(%arg0: i32) -> (i32, i32) {
    %c0_i32 = arith.constant 0 : i32
    %c0_i32_0 = arith.constant 0 : i32
    return %arg0, %c0_i32 : i32, i32
  }
}

</mosaic_0001>

<bundles_post_ra>
// kernel: custom_embedding.1
= control target key start
LH: loop header
LB: loop body
LE: loop exit
PB: predicated region body
PF: predicated region fallthrough
CT: control target
= control target key end

     0   :  { %9 = vsyncpa [#allocation3], 0  ;;  %s2196_s0 = inlined_call_operand.vmem [shape: s32[256,1], index: 0, kind: input, shape index: {}]   ;;  %s2197_s1 = inlined_call_operand.vmem [shape: s32[2], index: 1, kind: input, shape index: {}]   ;;  %s2198_s2 = inlined_call_operand.vmem [shape: f32[2,128], index: 2, kind: input, shape index: {}]   ;;  %s2199_s3 = inlined_call_operand.vmem [shape: f32[128,128], index: 3, kind: input, shape index: {}]   ;;  %s2200_s4 = inlined_call_operand.vmem [shape: f32[256,128], index: 4, kind: output, shape index: {}]  }
   0x1   :  { %s18_s17 = sshll.u32 %s2197_s1, 4  ;;  %s19_s17 = int_to_ptr.vmem [resolvable:$true] %s18_s17 }
   0x2   :  { %s1244_s18 = scalar_lea.vmem %s19_s17, 16  ;;  %p1249_p1 = scmp.lt.s32.totalorder %s19_s17, %s19_s17 }
   0x3   :  { %p1245_p0 = scmp.ne.s32.totalorder %s19_s17, %s1244_s18  ;;  %p1250_p2 = scmp.lt.s32.totalorder %s1244_s18, %s1244_s18 }
   0x5   :  { %p1251_p3 = por %p1250_p2, %p1249_p1 }
   0x7   :  { %p1252_p4 = pnand %p1251_p3, %p1245_p0 }
   0x9   :  { %1255 = shalt.err (!%p1252_p4)
}
   0xa   :  { %s1258_s19 = smov [#allocation2]  }
   0xb   :  { %21 = dma.vmem_to_smem %s19_s17, 16, %s1258_s19, [#allocation3]  }
   0xc   :  { %1256 = dma.done.wait [#allocation3], 16  }
   0xd   :  { %1257 = vsyncadd [#allocation3], 4294967280 }
   0xe   :  { %29 = sfence }
   0xf   :  { %v1292_v0 = vld [vmem:[%s2196_s0 + $0x10] sm:$0xff]  ;;  %v1297_v1 = vld [vmem:[%s2196_s0] sm:$0xff]  ;;  %s497_s23 = sld [smem:[#allocation2]]  ;;  %v1259_v2 = vmov 0   ;;  %v1306_v3 = vld [vmem:[%s2196_s0 + $0x18] sm:$0xff]  ;;  %s1061_s22 = sld [smem:[#allocation2 + $0x1]] }
  0x10   :  { %1243 = vset.pattern.permute.xlu1 %v1259_v2  ;;  %1242 = vset.pattern.permute.xlu0 %v1259_v2  ;;  %v1311_v4 = vld [vmem:[%s2196_s0 + $0x8] sm:$0xff]  ;;  %v1325_v7 = vld [vmem:[%s2196_s0 + $0x20] sm:$0xff]  ;;  %v1337_v9 = vld [vmem:[%s2196_s0 + $0x38] sm:$0xff] }
  0x11   :  { %71 = vperm.xlu1 %1243, %v1292_v0   ;;  %65 = vperm.xlu0 %1242, %v1297_v1   ;;  %v1320_v6 = vld [vmem:[%s2196_s0 + $0x28] sm:$0xff]  ;;  %v1342_v10 = vld [vmem:[%s2196_s0 + $0x30] sm:$0xff]  ;;  %v256_v11 = vld [vmem:[%s2199_s3] sm:$0xff] }
  0x12   :  { %v257_v12 = vld [vmem:[%s2199_s3 + $0x8] sm:$0xff]  ;;  %v258_v13 = vld [vmem:[%s2199_s3 + $0x10] sm:$0xff]  ;;  %v259_v14 = vld [vmem:[%s2199_s3 + $0x18] sm:$0xff] }
  0x13   :  { %v1361_v15 = vld [vmem:[%s2196_s0 + $0x48] sm:$0xff]  ;;  %v1366_v16 = vld [vmem:[%s2196_s0 + $0x40] sm:$0xff]  ;;  %v1191_v17 = vpack.c.bf16 %v257_v12, %v256_v11  ;;  %v1195_v18 = vpack.c.bf16 %v259_v14, %v258_v13  ;;  %v1379_v21 = vld [vmem:[%s2196_s0 + $0x58] sm:$0xff] }
  0x14   :  { %v260_v19 = vld [vmem:[%s2199_s3 + $0x20] sm:$0xff]  ;;  %v261_v20 = vld [vmem:[%s2199_s3 + $0x28] sm:$0xff]  ;;  %v1384_v22 = vld [vmem:[%s2196_s0 + $0x50] sm:$0xff] }
  0x15   :  { %74 = vperm.xlu1 %1243, %v1306_v3   ;;  %68 = vperm.xlu0 %1242, %v1311_v4   ;;  %v1315_v5 = vstv %s497_s23  ;;  %v1199_v23 = vpack.c.bf16 %v261_v20, %v260_v19  ;;  %v262_v24 = vld [vmem:[%s2199_s3 + $0x30] sm:$0xff]  ;;  %v263_v25 = vld [vmem:[%s2199_s3 + $0x38] sm:$0xff]  ;;  %v264_v26 = vld [vmem:[%s2199_s3 + $0x40] sm:$0xff] }
  0x16   :  { %vm501_vm0 = vcmp.eq.s32.totalorder %v1292_v0, %v1315_v5  ;;  %1192 = vmatprep.subr.bf16.mxu0 %v1191_v17  ;;  %1223 = vmatprep.subr.bf16.mxu1 %v1191_v17  ;;  %v265_v27 = vld [vmem:[%s2199_s3 + $0x48] sm:$0xff]  ;;  %v1408_v29 = vld [vmem:[%s2196_s0 + $0x60] sm:$0xff]  ;;  %v1203_v30 = vpack.c.bf16 %v263_v25, %v262_v24  ;;  %v1410_v31 = vstv %s1061_s22  ;;  %v1436_v36 = vld [vmem:[%s2196_s0 + $0x78] sm:$0xff] }
  0x17   :  { %v1330_v8 = vsel %vm501_vm0, 1, %v1259_v2  ;;  %1194 = vmatpush3.bf16.msra.mxu0 %v1191_v17  ;;  %1231 = vmatpush3.bf16.msra.mxu1 %v1191_v17  ;;  %v1403_v28 = vld [vmem:[%s2196_s0 + $0x68] sm:$0xff]  ;;  %v1412_v32 = vpack.c.bf16 %v265_v27, %v264_v26  ;;  %vm731_vm1 = vcmp.eq.s32.totalorder %v1311_v4, %v1410_v31  ;;  %vm730_vm2 = vcmp.eq.s32.totalorder %v1297_v1, %v1410_v31  ;;  %v1441_v37 = vld [vmem:[%s2196_s0 + $0x70] sm:$0xff]  ;;  %v267_v44 = vld [vmem:[%s2199_s3 + $0x58] sm:$0xff] }
  0x18   :  { %1196 = vmatprep.subr.bf16.mxu0 %v1195_v18  ;;  %1224 = vmatprep.subr.bf16.mxu1 %v1195_v18  ;;  %vm733_vm3 = vcmp.eq.s32.totalorder %v1306_v3, %v1410_v31  ;;  %v1423_v33 = vsel %vm731_vm1, 1, %v1259_v2  ;;  %v1426_v34 = vsel %vm730_vm2, 1, %v1259_v2  ;;  %vm732_vm4 = vcmp.eq.s32.totalorder %v1292_v0, %v1410_v31  ;;  %v266_v43 = vld [vmem:[%s2199_s3 + $0x50] sm:$0xff]  ;;  %v1494_v48 = vld [vmem:[%s2196_s0 + $0x88] sm:$0xff]  ;;  %v1499_v49 = vld [vmem:[%s2196_s0 + $0x80] sm:$0xff] }
  0x19   :  { %80 = vperm.xlu1 %1243, %v1320_v6   ;;  %77 = vperm.xlu0 %1242, %v1325_v7   ;;  %v1429_v35 = vsel %vm733_vm3, 1, %v1259_v2  ;;  %v1444_v38 = vsel %vm732_vm4, 1, %v1259_v2  ;;  %vm735_vm5 = vcmp.eq.s32.totalorder %v1320_v6, %v1410_v31  ;;  %vm734_vm6 = vcmp.eq.s32.totalorder %v1325_v7, %v1410_v31  ;;  %v268_v56 = vld [vmem:[%s2199_s3 + $0x60] sm:$0xff]  ;;  %v269_v57 = vld [vmem:[%s2199_s3 + $0x68] sm:$0xff]  ;;  %v1547_v60 = vld [vmem:[%s2196_s0 + $0x98] sm:$0xff] }
  0x1a   :  { %vm737_vm7 = vcmp.eq.s32.totalorder %v1337_v9, %v1410_v31  ;;  %v1453_v39 = vsel %vm735_vm5, 1, %v1259_v2  ;;  %v1456_v40 = vsel %vm734_vm6, 1, %v1259_v2  ;;  %vm736_vm8 = vcmp.eq.s32.totalorder %v1342_v10, %v1410_v31  ;;  %v1552_v61 = vld [vmem:[%s2196_s0 + $0x90] sm:$0xff]  ;;  %v271_v12 = vld [vmem:[%s2199_s3 + $0x78] sm:$0xff]  ;;  %v1577_v13 = vld [vmem:[%s2196_s0 + $0xa8] sm:$0xff] }
  0x1b   :  { %1198 = vmatpush3.bf16.msra.mxu0 %v1195_v18  ;;  %1232 = vmatpush3.bf16.msra.mxu1 %v1195_v18  ;;  %v1459_v41 = vsel %vm737_vm7, 1, %v1259_v2  ;;  %v1464_v42 = vsel %vm736_vm8, 1, %v1259_v2  ;;  %vm739_vm9 = vcmp.eq.s32.totalorder %v1361_v15, %v1410_v31  ;;  %vm738_vm10 = vcmp.eq.s32.totalorder %v1366_v16, %v1410_v31  ;;  %v270_v11 = vld [vmem:[%s2199_s3 + $0x70] sm:$0xff]  ;;  %v1582_v14 = vld [vmem:[%s2196_s0 + $0xa0] sm:$0xff]  ;;  %v1599_v20 = vld [vmem:[%s2196_s0 + $0xb8] sm:$0xff] }
  0x1c   :  { %1200 = vmatprep.subr.bf16.mxu0 %v1199_v23  ;;  %1225 = vmatprep.subr.bf16.mxu1 %v1199_v23  ;;  %vm741_vm11 = vcmp.eq.s32.totalorder %v1379_v21, %v1410_v31  ;;  %v1481_v45 = vsel %vm739_vm9, 1, %v1259_v2  ;;  %v1484_v46 = vsel %vm738_vm10, 1, %v1259_v2  ;;  %vm740_vm12 = vcmp.eq.s32.totalorder %v1384_v22, %v1410_v31  ;;  %v1621_v26 = vld [vmem:[%s2196_s0 + $0xc8] sm:$0xff]  ;;  %v1626_v27 = vld [vmem:[%s2196_s0 + $0xc0] sm:$0xff] }
  0x1d   :  { %86 = vperm.xlu1 %1243, %v1337_v9   ;;  %83 = vperm.xlu0 %1242, %v1342_v10   ;;  %v1487_v47 = vsel %vm741_vm11, 1, %v1259_v2  ;;  %v1502_v50 = vsel %vm740_vm12, 1, %v1259_v2  ;;  %vm743_vm13 = vcmp.eq.s32.totalorder %v1403_v28, %v1410_v31  ;;  %vm742_vm14 = vcmp.eq.s32.totalorder %v1408_v29, %v1410_v31 }
  0x1e   :  { %vm745_vm15 = vcmp.eq.s32.totalorder %v1436_v36, %v1410_v31  ;;  %v1511_v51 = vsel %vm743_vm13, 1, %v1259_v2  ;;  %v1514_v52 = vsel %vm742_vm14, 1, %v1259_v2  ;;  %vm744_vm0 = vcmp.eq.s32.totalorder %v1441_v37, %v1410_v31 }
  0x1f   :  { %1202 = vmatpush3.bf16.msra.mxu0 %v1199_v23  ;;  %1233 = vmatpush3.bf16.msra.mxu1 %v1199_v23  ;;  %v1517_v53 = vsel %vm745_vm15, 1, %v1259_v2  ;;  %v1211_v54 = vpack.c.bf16 %v267_v44, %v266_v43  ;;  %v1524_v55 = vsel %vm744_vm0, 1, %v1259_v2  ;;  %vm747_vm1 = vcmp.eq.s32.totalorder %v1494_v48, %v1410_v31  ;;  %v1604_v23 = vld [vmem:[%s2196_s0 + $0xb0] sm:$0xff]  ;;  %v1643_v43 = vld [vmem:[%s2196_s0 + $0xd8] sm:$0xff] }
  0x20   :  { %1204 = vmatprep.subr.bf16.mxu0 %v1203_v30  ;;  %1226 = vmatprep.subr.bf16.mxu1 %v1203_v30  ;;  %vm746_vm2 = vcmp.eq.s32.totalorder %v1499_v49, %v1410_v31  ;;  %v1539_v58 = vsel %vm747_vm1, 1, %v1259_v2  ;;  %vm749_vm3 = vcmp.eq.s32.totalorder %v1547_v60, %v1410_v31  ;;  %vm748_vm4 = vcmp.eq.s32.totalorder %v1552_v61, %v1410_v31  ;;  %v1648_v44 = vld [vmem:[%s2196_s0 + $0xd0] sm:$0xff] }
  0x21   :  { %92 = vperm.xlu1 %1243, %v1361_v15   ;;  %89 = vperm.xlu0 %1242, %v1366_v16   ;;  %v1542_v59 = vsel %vm746_vm2, 1, %v1259_v2  ;;  %v1215_v62 = vpack.c.bf16 %v269_v57, %v268_v56  ;;  %v1561_v63 = vsel %vm749_vm3, 1, %v1259_v2  ;;  %v1564_v0 = vsel %vm748_vm4, 1, %v1259_v2  ;;  %v1665_v57 = vld [vmem:[%s2196_s0 + $0xe8] sm:$0xff] }
  0x22   :  { %vm751_vm5 = vcmp.eq.s32.totalorder %v1577_v13, %v1410_v31  ;;  %vm750_vm6 = vcmp.eq.s32.totalorder %v1582_v14, %v1410_v31  ;;  %v1219_v17 = vpack.c.bf16 %v271_v12, %v270_v11  ;;  %vm753_vm7 = vcmp.eq.s32.totalorder %v1599_v20, %v1410_v31 }
  0x23   :  { %1206 = vmatpush3.bf16.msra.mxu0 %v1203_v30  ;;  %1234 = vmatpush3.bf16.msra.mxu1 %v1203_v30  ;;  %v1589_v18 = vsel %vm751_vm5, 1, %v1259_v2  ;;  %v1592_v19 = vsel %vm750_vm6, 1, %v1259_v2  ;;  %vm752_vm8 = vcmp.eq.s32.totalorder %v1604_v23, %v1410_v31  ;;  %v1611_v24 = vsel %vm753_vm7, 1, %v1259_v2 }
  0x24   :  { %1208 = vmatprep.subr.bf16.mxu0 %v1412_v32  ;;  %1227 = vmatprep.subr.bf16.mxu1 %v1412_v32  ;;  %v1614_v25 = vsel %vm752_vm8, 1, %v1259_v2  ;;  %vm755_vm9 = vcmp.eq.s32.totalorder %v1621_v26, %v1410_v31  ;;  %vm754_vm10 = vcmp.eq.s32.totalorder %v1626_v27, %v1410_v31  ;;  %vm757_vm11 = vcmp.eq.s32.totalorder %v1643_v43, %v1410_v31 }
  0x25   :  { %98 = vperm.xlu1 %1243, %v1379_v21   ;;  %95 = vperm.xlu0 %1242, %v1384_v22   ;;  %v1633_v30 = vsel %vm755_vm9, 1, %v1259_v2  ;;  %vm756_vm12 = vcmp.eq.s32.totalorder %v1648_v44, %v1410_v31  ;;  %vm759_vm13 = vcmp.eq.s32.totalorder %v1665_v57, %v1410_v31  ;;  %vm500_vm15 = vcmp.eq.s32.totalorder %v1311_v4, %v1315_v5 }
  0x26   :  { %v1658_v56 = vsel %vm756_vm12, 1, %v1259_v2  ;;  %v1677_v11 = vsel %vm759_vm13, 1, %v1259_v2  ;;  %vm499_vm0 = vcmp.eq.s32.totalorder %v1297_v1, %v1315_v5  ;;  %v533_v4 = vsel %vm500_vm15, 1, %v1259_v2 }
  0x27   :  { %1210 = vmatpush3.bf16.msra.mxu0 %v1412_v32  ;;  %1235 = vmatpush3.bf16.msra.mxu1 %v1412_v32  ;;  %v1636_v32 = vsel %vm754_vm10, 1, %v1259_v2  ;;  %2201 = vst [vmem:[#allocation5_spill] sm:$0xff] %v1658_v56  ;;  %2202 = vst [vmem:[#allocation6_spill] sm:$0xff] %v1677_v11  ;;  %v1692_v56 = vld [vmem:[%s2196_s0 + $0xf0] sm:$0xff]  ;;  %v532_v1 = vsel %vm499_vm0, 1, %v1259_v2  ;;  %vm502_vm3 = vcmp.eq.s32.totalorder %v1306_v3, %v1315_v5 }
  0x28   :  { %1212 = vmatprep.subr.bf16.mxu0 %v1211_v54  ;;  %1228 = vmatprep.subr.bf16.mxu1 %v1211_v54  ;;  %vm760_vm2 = vcmp.eq.s32.totalorder %v1692_v56, %v1410_v31  ;;  %vm504_vm4 = vcmp.eq.s32.totalorder %v1320_v6, %v1315_v5  ;;  %vm503_vm5 = vcmp.eq.s32.totalorder %v1325_v7, %v1315_v5 }
  0x29   :  { %104 = vperm.xlu1 %1243, %v1403_v28   ;;  %101 = vperm.xlu0 %1242, %v1408_v29   ;;  %v1706_v11 = vsel %vm760_vm2, 1, %v1259_v2  ;;  %vm506_vm6 = vcmp.eq.s32.totalorder %v1337_v9, %v1315_v5  ;;  %vm505_vm7 = vcmp.eq.s32.totalorder %v1342_v10, %v1315_v5  ;;  %vm508_vm8 = vcmp.eq.s32.totalorder %v1361_v15, %v1315_v5 }
  0x2a   :  { %2205 = vst [vmem:[#allocation9_spill] sm:$0xff] %v1706_v11  ;;  %v537_v11 = vsel %vm504_vm4, 1, %v1259_v2  ;;  %v539_v3 = vsel %vm506_vm6, 1, %v1259_v2  ;;  %v538_v6 = vsel %vm505_vm7, 1, %v1259_v2  ;;  %vm507_vm9 = vcmp.eq.s32.totalorder %v1366_v16, %v1315_v5 }
  0x2b   :  { %1214 = vmatpush3.bf16.msra.mxu0 %v1211_v54  ;;  %1236 = vmatpush3.bf16.msra.mxu1 %v1211_v54  ;;  %v1655_v54 = vsel %vm757_vm11, 1, %v1259_v2  ;;  %v541_v7 = vsel %vm508_vm8, 1, %v1259_v2  ;;  %vm510_vm10 = vcmp.eq.s32.totalorder %v1379_v21, %v1315_v5  ;;  %vm509_vm11 = vcmp.eq.s32.totalorder %v1384_v22, %v1315_v5 }
  0x2c   :  { %1216 = vmatprep.subr.bf16.mxu0 %v1215_v62  ;;  %1229 = vmatprep.subr.bf16.mxu1 %v1215_v62  ;;  %v543_v9 = vsel %vm510_vm10, 1, %v1259_v2  ;;  %v542_v10 = vsel %vm509_vm11, 1, %v1259_v2  ;;  %vm512_vm12 = vcmp.eq.s32.totalorder %v1403_v28, %v1315_v5  ;;  %vm511_vm13 = vcmp.eq.s32.totalorder %v1408_v29, %v1315_v5 }
  0x2d   :  { %110 = vperm.xlu1 %1243, %v1436_v36   ;;  %107 = vperm.xlu0 %1242, %v1441_v37   ;;  %v545_v15 = vsel %vm512_vm12, 1, %v1259_v2  ;;  %v544_v16 = vsel %vm511_vm13, 1, %v1259_v2  ;;  %vm513_vm15 = vcmp.eq.s32.totalorder %v1441_v37, %v1315_v5  ;;  %vm516_vm0 = vcmp.eq.s32.totalorder %v1494_v48, %v1315_v5 }
  0x2e   :  { %v546_v22 = vsel %vm513_vm15, 1, %v1259_v2  ;;  %v549_v28 = vsel %vm516_vm0, 1, %v1259_v2  ;;  %vm518_vm2 = vcmp.eq.s32.totalorder %v1547_v60, %v1315_v5  ;;  %vm520_vm4 = vcmp.eq.s32.totalorder %v1577_v13, %v1315_v5 }
  0x2f   :  { %1218 = vmatpush3.bf16.msra.mxu0 %v1215_v62  ;;  %1237 = vmatpush3.bf16.msra.mxu1 %v1215_v62  ;;  %v1670_v62 = vld [vmem:[%s2196_s0 + $0xe0] sm:$0xff]  ;;  %vm522_vm6 = vcmp.eq.s32.totalorder %v1599_v20, %v1315_v5  ;;  %vm521_vm7 = vcmp.eq.s32.totalorder %v1604_v23, %v1315_v5  ;;  %vm524_vm8 = vcmp.eq.s32.totalorder %v1621_v26, %v1315_v5 }
  0x30   :  { %1220 = vmatprep.subr.bf16.mxu0 %v1219_v17  ;;  %1230 = vmatprep.subr.bf16.mxu1 %v1219_v17  ;;  %vm758_vm14 = vcmp.eq.s32.totalorder %v1670_v62, %v1410_v31  ;;  %vm526_vm10 = vcmp.eq.s32.totalorder %v1643_v43, %v1315_v5  ;;  %vm525_vm11 = vcmp.eq.s32.totalorder %v1648_v44, %v1315_v5 }
  0x31   :  { %116 = vperm.xlu1 %1243, %v1494_v48   ;;  %113 = vperm.xlu0 %1242, %v1499_v49   ;;  %v1680_v12 = vsel %vm758_vm14, 1, %v1259_v2  ;;  %vm514_vm14 = vcmp.eq.s32.totalorder %v1436_v36, %v1315_v5  ;;  %v551_v36 = vsel %vm518_vm2, 1, %v1259_v2  ;;  %v553_v48 = vsel %vm520_vm4, 1, %v1259_v2 }
  0x32   :  { %2203 = vst [vmem:[#allocation7_spill] sm:$0xff] %v1680_v12  ;;  %v547_v21 = vsel %vm514_vm14, 1, %v1259_v2  ;;  %vm528_vm12 = vcmp.eq.s32.totalorder %v1665_v57, %v1315_v5  ;;  %vm527_vm13 = vcmp.eq.s32.totalorder %v1670_v62, %v1315_v5  ;;  %vm529_vm15 = vcmp.eq.s32.totalorder %v1692_v56, %v1315_v5 }
  0x33   :  { %1222 = vmatpush3.bf16.msra.mxu0 %v1219_v17  ;;  %1238 = vmatpush3.bf16.msra.mxu1 %v1219_v17  ;;  %v1687_v17 = vld [vmem:[%s2196_s0 + $0xf8] sm:$0xff] }
  0x34   :  { %vm761_vm1 = vcmp.eq.s32.totalorder %v1687_v17, %v1410_v31  ;;  %v535_v31 = vsel %vm502_vm3, 1, %v1259_v2  ;;  %vm517_vm3 = vcmp.eq.s32.totalorder %v1552_v61, %v1315_v5  ;;  %vm530_vm14 = vcmp.eq.s32.totalorder %v1687_v17, %v1315_v5 }
  0x35   :  { %122 = vperm.xlu1 %1243, %v1547_v60   ;;  %119 = vperm.xlu0 %1242, %v1552_v61   ;;  %v1703_v12 = vsel %vm761_vm1, 1, %v1259_v2  ;;  %vm515_vm1 = vcmp.eq.s32.totalorder %v1499_v49, %v1315_v5  ;;  %v550_v37 = vsel %vm517_vm3, 1, %v1259_v2  ;;  %v555_v60 = vsel %vm522_vm6, 1, %v1259_v2 }
  0x36   :  { %2204 = vst [vmem:[#allocation8_spill] sm:$0xff] %v1703_v12  ;;  %v536_v12 = vsel %vm503_vm5, 1, %v1259_v2  ;;  %v548_v29 = vsel %vm515_vm1, 1, %v1259_v2  ;;  %vm519_vm5 = vcmp.eq.s32.totalorder %v1582_v14, %v1315_v5  ;;  %v554_v61 = vsel %vm521_vm7, 1, %v1259_v2 }
  0x37   :  { %v552_v49 = vsel %vm519_vm5, 1, %v1259_v2 }
  0x39   :  { %128 = vperm.xlu1 %1243, %v1577_v13   ;;  %125 = vperm.xlu0 %1242, %v1582_v14   ;;  %v557_v13 = vsel %vm524_vm8, 1, %v1259_v2 }
  0x3d   :  { %134 = vperm.xlu1 %1243, %v1599_v20   ;;  %131 = vperm.xlu0 %1242, %v1604_v23   ;;  %v559_v20 = vsel %vm526_vm10, 1, %v1259_v2  ;;  %v558_v23 = vsel %vm525_vm11, 1, %v1259_v2 }
  0x41   :  { %140 = vperm.xlu1 %1243, %v1621_v26   ;;  %137 = vperm.xlu0 %1242, %v1626_v27   ;;  %v561_v26 = vsel %vm528_vm12, 1, %v1259_v2 }
  0x45   :  { %146 = vperm.xlu1 %1243, %v1643_v43   ;;  %143 = vperm.xlu0 %1242, %v1648_v44   ;;  %v62_v43 = vlaneseq  ;;  %v563_v44 = vsel %vm530_vm14, 1, %v1259_v2 }
  0x49   :  { %152 = vperm.xlu1 %1243, %v1665_v57   ;;  %149 = vperm.xlu0 %1242, %v1670_v62   ;;  %v562_v57 = vsel %vm529_vm15, 1, %v1259_v2  ;;  %v1800_v62 = vand.u32 127, %v62_v43 }
  0x4d   :  { %158 = vperm.xlu1 %1243, %v1687_v17   ;;  %155 = vperm.xlu0 %1242, %v1692_v56  }
  0x51   :  { %568 = vperm.xlu1 %1243, %v533_v4   ;;  %565 = vperm.xlu0 %1242, %v532_v1   ;;  %v2207_v4 = vld [vmem:[#allocation6_spill] sm:$0xff]  ;;  %v2208_v1 = vld [vmem:[#allocation7_spill] sm:$0xff] }
  0x55   :  { %574 = vperm.xlu1 %1243, %v535_v31   ;;  %571 = vperm.xlu0 %1242, %v1330_v8   ;;  %v540_v8 = vsel %vm507_vm9, 1, %v1259_v2  ;;  %vm523_vm9 = vcmp.eq.s32.totalorder %v1626_v27, %v1315_v5  ;;  %v560_v27 = vsel %vm527_vm13, 1, %v1259_v2  ;;  %v1260_v5 = vmov 1.0  }
  0x56   :  { %v556_v14 = vsel %vm523_vm9, 1, %v1259_v2 }
  0x59   :  { %580 = vperm.xlu1 %1243, %v537_v11   ;;  %577 = vperm.xlu0 %1242, %v536_v12  }
  0x5d   :  { %586 = vperm.xlu1 %1243, %v539_v3   ;;  %583 = vperm.xlu0 %1242, %v538_v6   ;;  %v2209_v3 = vld [vmem:[#allocation8_spill] sm:$0xff]  ;;  %v2210_v6 = vld [vmem:[#allocation9_spill] sm:$0xff] }
  0x61   :  { %592 = vperm.xlu1 %1243, %v541_v7   ;;  %589 = vperm.xlu0 %1242, %v540_v8  }
  0x65   :  { %598 = vperm.xlu1 %1243, %v543_v9   ;;  %595 = vperm.xlu0 %1242, %v542_v10  }
  0x69   :  { %604 = vperm.xlu1 %1243, %v545_v15   ;;  %601 = vperm.xlu0 %1242, %v544_v16  }
  0x6d   :  { %610 = vperm.xlu1 %1243, %v547_v21   ;;  %607 = vperm.xlu0 %1242, %v546_v22  }
  0x71   :  { %616 = vperm.xlu1 %1243, %v549_v28   ;;  %613 = vperm.xlu0 %1242, %v548_v29  }
  0x75   :  { %622 = vperm.xlu1 %1243, %v551_v36   ;;  %619 = vperm.xlu0 %1242, %v550_v37  }
  0x79   :  { %628 = vperm.xlu1 %1243, %v553_v48   ;;  %625 = vperm.xlu0 %1242, %v552_v49  }
  0x7d   :  { %634 = vperm.xlu1 %1243, %v555_v60   ;;  %631 = vperm.xlu0 %1242, %v554_v61  }
  0x81   :  { %640 = vperm.xlu1 %1243, %v557_v13   ;;  %637 = vperm.xlu0 %1242, %v556_v14  }
  0x85   :  { %646 = vperm.xlu1 %1243, %v559_v20   ;;  %643 = vperm.xlu0 %1242, %v558_v23  }
  0x89   :  { %652 = vperm.xlu1 %1243, %v561_v26   ;;  %649 = vperm.xlu0 %1242, %v560_v27  }
  0x8d   :  { %658 = vperm.xlu1 %1243, %v563_v44   ;;  %655 = vperm.xlu0 %1242, %v562_v57  }
  0x90   :  { %v72_v11 = vpop.permute.xlu1 %71  ;;  %v66_v12 = vpop.permute.xlu0 %65 }
  0x91   :  { %799 = vperm.xlu1 %1243, %v1423_v33   ;;  %796 = vperm.xlu0 %1242, %v1426_v34   ;;  %vm160_vm0 = vcmp.eq.s32.totalorder %v1800_v62, %v66_v12  ;;  %vm162_vm2 = vcmp.eq.s32.totalorder %v1800_v62, %v72_v11 }
  0x92   :  { %1143 = vmatprep.mubr.msk.f32.mxu0 %vm160_vm0, %v1260_v5 }
  0x94   :  { %v75_v56 = vpop.permute.xlu1 %74  ;;  %v69_v17 = vpop.permute.xlu0 %68 }
  0x95   :  { %vm161_vm1 = vcmp.eq.s32.totalorder %v1800_v62, %v69_v17  ;;  %805 = vperm.xlu1 %1243, %v1429_v35   ;;  %802 = vperm.xlu0 %1242, %v1444_v38   ;;  %vm163_vm3 = vcmp.eq.s32.totalorder %v1800_v62, %v75_v56 }
  0x96   :  { %1144 = vmatmul.mubr.msk.f32.vlgmr.msra.gmra.mrb[0].mxu0 %vm161_vm1, %v1260_v5 }
  0x97   :  { %1146 = vmatprep.mubr.msk.f32.mxu0 %vm162_vm2, %v1260_v5 }
  0x98   :  { %v81_v2 = vpop.permute.xlu1 %80  ;;  %v78_v33 = vpop.permute.xlu0 %77 }
  0x99   :  { %vm164_vm4 = vcmp.eq.s32.totalorder %v1800_v62, %v78_v33  ;;  %811 = vperm.xlu1 %1243, %v1453_v39   ;;  %808 = vperm.xlu0 %1242, %v1456_v40   ;;  %vm165_vm5 = vcmp.eq.s32.totalorder %v1800_v62, %v81_v2 }
  0x9a   :  { %1147 = vmatmul.mubr.msk.f32.gmra.mrb[2].mxu0 %vm163_vm3, %v1260_v5 }
  0x9b   :  { %1149 = vmatprep.mubr.msk.f32.mxu0 %vm164_vm4, %v1260_v5 }
  0x9c   :  { %v87_v34 = vpop.permute.xlu1 %86  ;;  %v84_v35 = vpop.permute.xlu0 %83 }
  0x9d   :  { %vm166_vm6 = vcmp.eq.s32.totalorder %v1800_v62, %v84_v35  ;;  %817 = vperm.xlu1 %1243, %v1459_v41   ;;  %814 = vperm.xlu0 %1242, %v1464_v42   ;;  %vm167_vm7 = vcmp.eq.s32.totalorder %v1800_v62, %v87_v34 }
  0x9e   :  { %1150 = vmatmul.mubr.msk.f32.gmra.mrb[4].mxu0 %vm165_vm5, %v1260_v5 }
  0x9f   :  { %1152 = vmatprep.mubr.msk.f32.mxu0 %vm166_vm6, %v1260_v5 }
  0xa0   :  { %v93_v38 = vpop.permute.xlu1 %92  ;;  %v90_v39 = vpop.permute.xlu0 %89 }
  0xa1   :  { %vm168_vm8 = vcmp.eq.s32.totalorder %v1800_v62, %v90_v39  ;;  %823 = vperm.xlu1 %1243, %v1481_v45   ;;  %820 = vperm.xlu0 %1242, %v1484_v46   ;;  %vm169_vm9 = vcmp.eq.s32.totalorder %v1800_v62, %v93_v38 }
  0xa2   :  { %1153 = vmatmul.mubr.msk.f32.gmra.mrb[6].mxu0 %vm167_vm7, %v1260_v5 }
  0xa3   :  { %1155 = vmatprep.mubr.msk.f32.mxu0 %vm168_vm8, %v1260_v5 }
  0xa4   :  { %v99_v40 = vpop.permute.xlu1 %98  ;;  %v96_v41 = vpop.permute.xlu0 %95 }
  0xa5   :  { %vm170_vm10 = vcmp.eq.s32.totalorder %v1800_v62, %v96_v41  ;;  %829 = vperm.xlu1 %1243, %v1487_v47   ;;  %826 = vperm.xlu0 %1242, %v1502_v50   ;;  %vm171_vm11 = vcmp.eq.s32.totalorder %v1800_v62, %v99_v40 }
  0xa6   :  { %1156 = vmatmul.mubr.msk.f32.gmra.mrb[8].mxu0 %vm169_vm9, %v1260_v5 }
  0xa7   :  { %1158 = vmatprep.mubr.msk.f32.mxu0 %vm170_vm10, %v1260_v5 }
  0xa8   :  { %v105_v42 = vpop.permute.xlu1 %104  ;;  %v102_v45 = vpop.permute.xlu0 %101 }
  0xa9   :  { %vm172_vm12 = vcmp.eq.s32.totalorder %v1800_v62, %v102_v45  ;;  %835 = vperm.xlu1 %1243, %v1511_v51   ;;  %832 = vperm.xlu0 %1242, %v1514_v52   ;;  %vm173_vm13 = vcmp.eq.s32.totalorder %v1800_v62, %v105_v42 }
  0xaa   :  { %1159 = vmatmul.mubr.msk.f32.gmra.mrb[10].mxu0 %vm171_vm11, %v1260_v5 }
  0xab   :  { %1161 = vmatprep.mubr.msk.f32.mxu0 %vm172_vm12, %v1260_v5 }
  0xac   :  { %v111_v46 = vpop.permute.xlu1 %110  ;;  %v108_v47 = vpop.permute.xlu0 %107 }
  0xad   :  { %vm174_vm14 = vcmp.eq.s32.totalorder %v1800_v62, %v108_v47  ;;  %841 = vperm.xlu1 %1243, %v1517_v53   ;;  %838 = vperm.xlu0 %1242, %v1524_v55   ;;  %vm175_vm15 = vcmp.eq.s32.totalorder %v1800_v62, %v111_v46 }
  0xae   :  { %1162 = vmatmul.mubr.msk.f32.gmra.mrb[12].mxu0 %vm173_vm13, %v1260_v5 }
  0xaf   :  { %1164 = vmatprep.mubr.msk.f32.mxu0 %vm174_vm14, %v1260_v5 }
  0xb0   :  { %v117_v50 = vpop.permute.xlu1 %116  ;;  %v114_v51 = vpop.permute.xlu0 %113 }
  0xb1   :  { %vm177_vm0 = vcmp.eq.s32.totalorder %v1800_v62, %v117_v50  ;;  %847 = vperm.xlu1 %1243, %v1539_v58   ;;  %844 = vperm.xlu0 %1242, %v1542_v59   ;;  %vm176_vm1 = vcmp.eq.s32.totalorder %v1800_v62, %v114_v51  ;;  %v1969_v51 = vld [vmem:[%s2198_s2] ss:$0 sm:$0xff] }
  0xb2   :  { %1165 = vmatmul.mubr.msk.f32.gmra.mrb[14].mxu0 %vm175_vm15, %v1260_v5  ;;  %1167 = vmatprep.mubr.msk.f32.mxu1 %vm176_vm1, %v1260_v5 }
  0xb3   :  { %1168 = vmatmul.mubr.msk.f32.vlgmr.msra.gmra.mrb[0].mxu1 %vm177_vm0, %v1260_v5 }
  0xb4   :  { %v123_v52 = vpop.permute.xlu1 %122  ;;  %v120_v53 = vpop.permute.xlu0 %119 }
  0xb5   :  { %vm179_vm2 = vcmp.eq.s32.totalorder %v1800_v62, %v123_v52  ;;  %vm178_vm3 = vcmp.eq.s32.totalorder %v1800_v62, %v120_v53  ;;  %853 = vperm.xlu1 %1243, %v1561_v63   ;;  %850 = vperm.xlu0 %1242, %v1564_v0   ;;  %v1974_v52 = vld [vmem:[%s2198_s2 + $0x1] ss:$0 sm:$0xff] }
  0xb6   :  { %1170 = vmatprep.mubr.msk.f32.mxu1 %vm178_vm3, %v1260_v5 }
  0xb7   :  { %1171 = vmatmul.mubr.msk.f32.gmra.mrb[2].mxu1 %vm179_vm2, %v1260_v5 }
  0xb8   :  { %v129_v55 = vpop.permute.xlu1 %128  ;;  %v126_v58 = vpop.permute.xlu0 %125 }
  0xb9   :  { %vm181_vm4 = vcmp.eq.s32.totalorder %v1800_v62, %v129_v55  ;;  %vm180_vm5 = vcmp.eq.s32.totalorder %v1800_v62, %v126_v58  ;;  %859 = vperm.xlu1 %1243, %v1589_v18   ;;  %856 = vperm.xlu0 %1242, %v1592_v19  }
  0xba   :  { %1173 = vmatprep.mubr.msk.f32.mxu1 %vm180_vm5, %v1260_v5 }
  0xbb   :  { %1174 = vmatmul.mubr.msk.f32.gmra.mrb[4].mxu1 %vm181_vm4, %v1260_v5 }
  0xbc   :  { %v135_v59 = vpop.permute.xlu1 %134  ;;  %v132_v63 = vpop.permute.xlu0 %131 }
  0xbd   :  { %vm183_vm6 = vcmp.eq.s32.totalorder %v1800_v62, %v135_v59  ;;  %vm182_vm7 = vcmp.eq.s32.totalorder %v1800_v62, %v132_v63  ;;  %865 = vperm.xlu1 %1243, %v1611_v24   ;;  %862 = vperm.xlu0 %1242, %v1614_v25   ;;  %v2206_v25 = vld [vmem:[#allocation5_spill] sm:$0xff] }
  0xbe   :  { %1176 = vmatprep.mubr.msk.f32.mxu1 %vm182_vm7, %v1260_v5 }
  0xbf   :  { %1177 = vmatmul.mubr.msk.f32.gmra.mrb[6].mxu1 %vm183_vm6, %v1260_v5 }
  0xc0   :  { %v141_v0 = vpop.permute.xlu1 %140  ;;  %v138_v18 = vpop.permute.xlu0 %137 }
  0xc1   :  { %vm185_vm8 = vcmp.eq.s32.totalorder %v1800_v62, %v141_v0  ;;  %vm184_vm9 = vcmp.eq.s32.totalorder %v1800_v62, %v138_v18  ;;  %871 = vperm.xlu1 %1243, %v1633_v30   ;;  %868 = vperm.xlu0 %1242, %v1636_v32  }
  0xc2   :  { %1179 = vmatprep.mubr.msk.f32.mxu1 %vm184_vm9, %v1260_v5 }
  0xc3   :  { %1180 = vmatmul.mubr.msk.f32.gmra.mrb[8].mxu1 %vm185_vm8, %v1260_v5 }
  0xc4   :  { %v147_v19 = vpop.permute.xlu1 %146  ;;  %v144_v24 = vpop.permute.xlu0 %143 }
  0xc5   :  { %vm187_vm10 = vcmp.eq.s32.totalorder %v1800_v62, %v147_v19  ;;  %vm186_vm11 = vcmp.eq.s32.totalorder %v1800_v62, %v144_v24  ;;  %877 = vperm.xlu1 %1243, %v1655_v54   ;;  %874 = vperm.xlu0 %1242, %v2206_v25  }
  0xc6   :  { %1182 = vmatprep.mubr.msk.f32.mxu1 %vm186_vm11, %v1260_v5 }
  0xc7   :  { %1183 = vmatmul.mubr.msk.f32.gmra.mrb[10].mxu1 %vm187_vm10, %v1260_v5 }
  0xc8   :  { %v153_v30 = vpop.permute.xlu1 %152  ;;  %v150_v32 = vpop.permute.xlu0 %149 }
  0xc9   :  { %vm189_vm12 = vcmp.eq.s32.totalorder %v1800_v62, %v153_v30  ;;  %vm188_vm13 = vcmp.eq.s32.totalorder %v1800_v62, %v150_v32  ;;  %883 = vperm.xlu1 %1243, %v2207_v4   ;;  %880 = vperm.xlu0 %1242, %v2208_v1  }
  0xca   :  { %1185 = vmatprep.mubr.msk.f32.mxu1 %vm188_vm13, %v1260_v5 }
  0xcb   :  { %1186 = vmatmul.mubr.msk.f32.gmra.mrb[12].mxu1 %vm189_vm12, %v1260_v5 }
  0xcc   :  { %v159_v54 = vpop.permute.xlu1 %158  ;;  %v156_v31 = vpop.permute.xlu0 %155 }
  0xcd   :  { %vm191_vm14 = vcmp.eq.s32.totalorder %v1800_v62, %v159_v54  ;;  %vm190_vm15 = vcmp.eq.s32.totalorder %v1800_v62, %v156_v31  ;;  %889 = vperm.xlu1 %1243, %v2209_v3   ;;  %886 = vperm.xlu0 %1242, %v2210_v6  }
  0xce   :  { %1188 = vmatprep.mubr.msk.f32.mxu1 %vm190_vm15, %v1260_v5 }
  0xcf   :  { %1189 = vmatmul.mubr.msk.f32.gmra.mrb[14].mxu1 %vm191_vm14, %v1260_v5 }
  0xd0   :  { %v569_v7 = vpop.permute.xlu1 %568  ;;  %v566_v8 = vpop.permute.xlu0 %565 }
  0xd1   :  { %vm661_vm0 = vcmp.eq.s32.totalorder %v569_v7, 1  ;;  %vm660_vm1 = vcmp.eq.s32.totalorder %v566_v8, 1 }
  0xd4   :  { %v1898_v9 = vpop.permute.xlu1 %574  ;;  %v1900_v10 = vpop.permute.xlu0 %571 }
  0xd5   :  { %vm663_vm4 = vcmp.eq.s32.totalorder %v1898_v9, 1  ;;  %vm662_vm5 = vcmp.eq.s32.totalorder %v1900_v10, 1 }
  0xd8   :  { %v1902_v15 = vpop.permute.xlu1 %580  ;;  %v1904_v16 = vpop.permute.xlu0 %577 }
  0xd9   :  { %vm665_vm8 = vcmp.eq.s32.totalorder %v1902_v15, 1  ;;  %vm664_vm9 = vcmp.eq.s32.totalorder %v1904_v16, 1 }
  0xdc   :  { %v1906_v21 = vpop.permute.xlu1 %586  ;;  %v1908_v22 = vpop.permute.xlu0 %583 }
  0xdd   :  { %vm667_vm12 = vcmp.eq.s32.totalorder %v1906_v21, 1  ;;  %vm666_vm13 = vcmp.eq.s32.totalorder %v1908_v22, 1 }
  0xe0   :  { %v1910_v28 = vpop.permute.xlu1 %592  ;;  %v1912_v29 = vpop.permute.xlu0 %589 }
  0xe4   :  { %v1914_v36 = vpop.permute.xlu1 %598  ;;  %v1916_v37 = vpop.permute.xlu0 %595 }
  0xe8   :  { %v1918_v48 = vpop.permute.xlu1 %604  ;;  %v1920_v49 = vpop.permute.xlu0 %601 }
  0xec   :  { %v1922_v60 = vpop.permute.xlu1 %610  ;;  %v1924_v61 = vpop.permute.xlu0 %607 }
  0xf0   :  { %v1926_v13 = vpop.permute.xlu1 %616  ;;  %v1928_v14 = vpop.permute.xlu0 %613 }
  0xf4   :  { %v1930_v20 = vpop.permute.xlu1 %622  ;;  %v1932_v23 = vpop.permute.xlu0 %619 }
  0xf8   :  { %v1934_v26 = vpop.permute.xlu1 %628  ;;  %v1936_v27 = vpop.permute.xlu0 %625 }
  0xfc   :  { %v1938_v43 = vpop.permute.xlu1 %634  ;;  %v1940_v44 = vpop.permute.xlu0 %631 }
 0x100   :  { %v1942_v57 = vpop.permute.xlu1 %640  ;;  %v1944_v62 = vpop.permute.xlu0 %637 }
 0x104   :  { %v1946_v11 = vpop.permute.xlu1 %646  ;;  %v1948_v12 = vpop.permute.xlu0 %643 }
 0x108   :  { %v1950_v5 = vpop.permute.xlu1 %652  ;;  %v1952_v56 = vpop.permute.xlu0 %649 }
 0x10c   :  { %v1954_v17 = vpop.permute.xlu1 %658  ;;  %v1956_v2 = vpop.permute.xlu0 %655 }
 0x110   :  { %v800_v33 = vpop.permute.xlu1 %799  ;;  %v797_v34 = vpop.permute.xlu0 %796 }
 0x111   :  { %vm892_vm2 = vcmp.eq.s32.totalorder %v800_v33, 1  ;;  %vm891_vm3 = vcmp.eq.s32.totalorder %v797_v34, 1 }
 0x114   :  { %v806_v35 = vpop.permute.xlu1 %805  ;;  %v803_v38 = vpop.permute.xlu0 %802 }
 0x115   :  { %vm894_vm6 = vcmp.eq.s32.totalorder %v806_v35, 1  ;;  %vm893_vm7 = vcmp.eq.s32.totalorder %v803_v38, 1 }
 0x118   :  { %v812_v39 = vpop.permute.xlu1 %811  ;;  %v809_v40 = vpop.permute.xlu0 %808 }
 0x119   :  { %vm896_vm10 = vcmp.eq.s32.totalorder %v812_v39, 1  ;;  %vm895_vm11 = vcmp.eq.s32.totalorder %v809_v40, 1 }
 0x11c   :  { %v818_v41 = vpop.permute.xlu1 %817  ;;  %v815_v42 = vpop.permute.xlu0 %814 }
 0x11d   :  { %vm898_vm14 = vcmp.eq.s32.totalorder %v818_v41, 1  ;;  %vm897_vm15 = vcmp.eq.s32.totalorder %v815_v42, 1 }
 0x120   :  { %v1958_v45 = vpop.permute.xlu1 %823  ;;  %v1960_v46 = vpop.permute.xlu0 %820 }
 0x124   :  { %v1962_v47 = vpop.permute.xlu1 %829  ;;  %v1964_v50 = vpop.permute.xlu0 %826 }
 0x128   :  { %v1976_v55 = vpop.permute.xlu1 %835  ;;  %v1979_v63 = vpop.permute.xlu0 %832 }
 0x12c   :  { %v1995_v1 = vpop.permute.xlu1 %841  ;;  %v2002_v31 = vpop.permute.xlu0 %838 }
 0x130   :  { %v2020_v16 = vpop.permute.xlu1 %847  ;;  %v2023_v35 = vpop.permute.xlu0 %844 }
 0x169   :  { %v1145_v53 = vpop.f32.mrb[0].mxu0 }
 0x16a   :  { %v697_v58 = vsel %vm661_vm0, %v1969_v51, %v1145_v53  ;;  %v338_v59 = vpop.f32.mrb[1].mxu0  ;;  %vm669_vm0 = vcmp.eq.s32.totalorder %v1910_v28, 1 }
 0x16b   :  { %v928_v0 = vsel %vm892_vm2, %v1974_v52, %v697_v58  ;;  %v696_v18 = vsel %vm660_vm1, %v1969_v51, %v338_v59  ;;  %vm668_vm1 = vcmp.eq.s32.totalorder %v1912_v29, 1  ;;  %vm900_vm2 = vcmp.eq.s32.totalorder %v1958_v45, 1  ;;  %v2041_v58 = vpop.permute.xlu1 %853  ;;  %v2048_v29 = vpop.permute.xlu0 %850 }
 0x16c   :  { %960 = vst [vmem:[%s2200_s4 + $0x8] sm:$0xff] %v928_v0  ;;  %v927_v19 = vsel %vm891_vm3, %v1974_v52, %v696_v18  ;;  %vm899_vm3 = vcmp.eq.s32.totalorder %v1960_v46, 1 }
 0x16d   :  { %959 = vst [vmem:[%s2200_s4] sm:$0xff] %v927_v19  ;;  %v1148_v24 = vpop.f32.mrb[2].mxu0 }
 0x16e   :  { %v699_v25 = vsel %vm663_vm4, %v1969_v51, %v1148_v24  ;;  %v348_v30 = vpop.f32.mrb[3].mxu0  ;;  %vm671_vm4 = vcmp.eq.s32.totalorder %v1914_v36, 1 }
 0x16f   :  { %v930_v32 = vsel %vm894_vm6, %v1974_v52, %v699_v25  ;;  %v698_v4 = vsel %vm662_vm5, %v1969_v51, %v348_v30  ;;  %vm670_vm5 = vcmp.eq.s32.totalorder %v1916_v37, 1  ;;  %vm902_vm6 = vcmp.eq.s32.totalorder %v1962_v47, 1  ;;  %v860_v47 = vpop.permute.xlu1 %859  ;;  %v857_v24 = vpop.permute.xlu0 %856 }
 0x170   :  { %962 = vst [vmem:[%s2200_s4 + $0x18] sm:$0xff] %v930_v32  ;;  %v929_v54 = vsel %vm893_vm7, %v1974_v52, %v698_v4  ;;  %vm901_vm7 = vcmp.eq.s32.totalorder %v1964_v50, 1 }
 0x171   :  { %961 = vst [vmem:[%s2200_s4 + $0x10] sm:$0xff] %v929_v54  ;;  %v1151_v3 = vpop.f32.mrb[4].mxu0 }
 0x172   :  { %v701_v6 = vsel %vm665_vm8, %v1969_v51, %v1151_v3  ;;  %v358_v7 = vpop.f32.mrb[5].mxu0  ;;  %vm673_vm8 = vcmp.eq.s32.totalorder %v1918_v48, 1 }
 0x173   :  { %v932_v8 = vsel %vm896_vm10, %v1974_v52, %v701_v6  ;;  %v700_v9 = vsel %vm664_vm9, %v1969_v51, %v358_v7  ;;  %vm672_vm9 = vcmp.eq.s32.totalorder %v1920_v49, 1  ;;  %vm904_vm10 = vcmp.eq.s32.totalorder %v1976_v55, 1  ;;  %v866_v54 = vpop.permute.xlu1 %865  ;;  %v863_v6 = vpop.permute.xlu0 %862 }
 0x174   :  { %964 = vst [vmem:[%s2200_s4 + $0x28] sm:$0xff] %v932_v8  ;;  %v931_v10 = vsel %vm895_vm11, %v1974_v52, %v700_v9  ;;  %vm903_vm11 = vcmp.eq.s32.totalorder %v1979_v63, 1 }
 0x175   :  { %963 = vst [vmem:[%s2200_s4 + $0x20] sm:$0xff] %v931_v10  ;;  %v1154_v15 = vpop.f32.mrb[6].mxu0 }
 0x176   :  { %v703_v33 = vsel %vm667_vm12, %v1969_v51, %v1154_v15  ;;  %v368_v34 = vpop.f32.mrb[7].mxu0  ;;  %vm675_vm12 = vcmp.eq.s32.totalorder %v1922_v60, 1 }
 0x177   :  { %v934_v38 = vsel %vm898_vm14, %v1974_v52, %v703_v33  ;;  %v702_v21 = vsel %vm666_vm13, %v1969_v51, %v368_v34  ;;  %vm674_vm13 = vcmp.eq.s32.totalorder %v1924_v61, 1  ;;  %vm677_vm14 = vcmp.eq.s32.totalorder %v1926_v13, 1  ;;  %v869_v33 = vpop.permute.xlu0 %868 }
 0x178   :  { %966 = vst [vmem:[%s2200_s4 + $0x38] sm:$0xff] %v934_v38  ;;  %v933_v39 = vsel %vm897_vm15, %v1974_v52, %v702_v21  ;;  %vm676_vm15 = vcmp.eq.s32.totalorder %v1928_v14, 1 }
 0x179   :  { %965 = vst [vmem:[%s2200_s4 + $0x30] sm:$0xff] %v933_v39  ;;  %v1157_v22 = vpop.f32.mrb[8].mxu0 }
 0x17a   :  { %v705_v40 = vsel %vm669_vm0, %v1969_v51, %v1157_v22  ;;  %v378_v41 = vpop.f32.mrb[9].mxu0  ;;  %vm906_vm0 = vcmp.eq.s32.totalorder %v1995_v1, 1 }
 0x17b   :  { %v936_v42 = vsel %vm900_vm2, %v1974_v52, %v705_v40  ;;  %v704_v53 = vsel %vm668_vm1, %v1969_v51, %v378_v41  ;;  %vm905_vm1 = vcmp.eq.s32.totalorder %v2002_v31, 1  ;;  %vm908_vm2 = vcmp.eq.s32.totalorder %v2020_v16, 1 }
 0x17c   :  { %968 = vst [vmem:[%s2200_s4 + $0x48] sm:$0xff] %v936_v42  ;;  %v935_v28 = vsel %vm899_vm3, %v1974_v52, %v704_v53  ;;  %vm907_vm3 = vcmp.eq.s32.totalorder %v2023_v35, 1  ;;  %v875_v53 = vpop.permute.xlu0 %874 }
 0x17d   :  { %967 = vst [vmem:[%s2200_s4 + $0x40] sm:$0xff] %v935_v28  ;;  %v1160_v45 = vpop.f32.mrb[10].mxu0 }
 0x17e   :  { %v707_v46 = vsel %vm671_vm4, %v1969_v51, %v1160_v45  ;;  %v388_v59 = vpop.f32.mrb[11].mxu0  ;;  %vm679_vm4 = vcmp.eq.s32.totalorder %v1930_v20, 1 }
 0x17f   :  { %v938_v0 = vsel %vm902_vm6, %v1974_v52, %v707_v46  ;;  %v706_v36 = vsel %vm670_vm5, %v1969_v51, %v388_v59  ;;  %vm678_vm5 = vcmp.eq.s32.totalorder %v1932_v23, 1  ;;  %vm910_vm6 = vcmp.eq.s32.totalorder %v2041_v58, 1  ;;  %v872_v23 = vpop.permute.xlu1 %871 }
 0x180   :  { %970 = vst [vmem:[%s2200_s4 + $0x58] sm:$0xff] %v938_v0  ;;  %v937_v18 = vsel %vm901_vm7, %v1974_v52, %v706_v36  ;;  %vm909_vm7 = vcmp.eq.s32.totalorder %v2048_v29, 1  ;;  %v881_v59 = vpop.permute.xlu0 %880 }
 0x181   :  { %969 = vst [vmem:[%s2200_s4 + $0x50] sm:$0xff] %v937_v18  ;;  %v1163_v37 = vpop.f32.mrb[12].mxu0 }
 0x182   :  { %v709_v50 = vsel %vm673_vm8, %v1969_v51, %v1163_v37  ;;  %v398_v19 = vpop.f32.mrb[13].mxu0  ;;  %vm681_vm8 = vcmp.eq.s32.totalorder %v1934_v26, 1 }
 0x183   :  { %v940_v25 = vsel %vm904_vm10, %v1974_v52, %v709_v50  ;;  %v708_v48 = vsel %vm672_vm9, %v1969_v51, %v398_v19  ;;  %vm680_vm9 = vcmp.eq.s32.totalorder %v1936_v27, 1  ;;  %vm912_vm10 = vcmp.eq.s32.totalorder %v860_v47, 1  ;;  %v878_v40 = vpop.permute.xlu1 %877 }
 0x184   :  { %972 = vst [vmem:[%s2200_s4 + $0x68] sm:$0xff] %v940_v25  ;;  %v939_v30 = vsel %vm903_vm11, %v1974_v52, %v708_v48  ;;  %vm911_vm11 = vcmp.eq.s32.totalorder %v857_v24, 1  ;;  %v887_v48 = vpop.permute.xlu0 %886 }
 0x185   :  { %971 = vst [vmem:[%s2200_s4 + $0x60] sm:$0xff] %v939_v30  ;;  %v1166_v49 = vpop.f32.mrb[14].mxu0 }
 0x186   :  { %v711_v55 = vsel %vm675_vm12, %v1969_v51, %v1166_v49  ;;  %v408_v63 = vpop.f32.mrb[15].mxu0  ;;  %v1169_v32 = vpop.f32.mrb[0].mxu1  ;;  %vm683_vm12 = vcmp.eq.s32.totalorder %v1938_v43, 1 }
 0x187   :  { %v942_v60 = vsel %vm906_vm0, %v1974_v52, %v711_v55  ;;  %v710_v61 = vsel %vm674_vm13, %v1969_v51, %v408_v63  ;;  %v713_v13 = vsel %vm677_vm14, %v1969_v51, %v1169_v32  ;;  %v418_v4 = vpop.f32.mrb[1].mxu1  ;;  %vm682_vm13 = vcmp.eq.s32.totalorder %v1940_v44, 1  ;;  %v884_v46 = vpop.permute.xlu1 %883 }
 0x188   :  { %974 = vst [vmem:[%s2200_s4 + $0x78] sm:$0xff] %v942_v60  ;;  %v941_v1 = vsel %vm905_vm1, %v1974_v52, %v710_v61  ;;  %v944_v31 = vsel %vm908_vm2, %v1974_v52, %v713_v13  ;;  %v712_v3 = vsel %vm676_vm15, %v1969_v51, %v418_v4  ;;  %vm914_vm14 = vcmp.eq.s32.totalorder %v866_v54, 1 }
 0x189   :  { %973 = vst [vmem:[%s2200_s4 + $0x70] sm:$0xff] %v941_v1  ;;  %976 = vst [vmem:[%s2200_s4 + $0x88] sm:$0xff] %v944_v31  ;;  %v943_v7 = vsel %vm907_vm3, %v1974_v52, %v712_v3  ;;  %vm913_vm15 = vcmp.eq.s32.totalorder %v863_v6, 1  ;;  %vm685_vm0 = vcmp.eq.s32.totalorder %v1942_v57, 1  ;;  %vm684_vm1 = vcmp.eq.s32.totalorder %v1944_v62, 1 }
 0x18a   :  { %975 = vst [vmem:[%s2200_s4 + $0x80] sm:$0xff] %v943_v7  ;;  %v1172_v8 = vpop.f32.mrb[2].mxu1  ;;  %vm916_vm2 = vcmp.eq.s32.totalorder %v872_v23, 1  ;;  %vm915_vm3 = vcmp.eq.s32.totalorder %v869_v33, 1 }
 0x18b   :  { %v715_v14 = vsel %vm679_vm4, %v1969_v51, %v1172_v8  ;;  %v428_v9 = vpop.f32.mrb[3].mxu1  ;;  %vm687_vm4 = vcmp.eq.s32.totalorder %v1946_v11, 1  ;;  %v890_v19 = vpop.permute.xlu1 %889 }
 0x18c   :  { %v946_v10 = vsel %vm910_vm6, %v1974_v52, %v715_v14  ;;  %v714_v15 = vsel %vm678_vm5, %v1969_v51, %v428_v9  ;;  %vm686_vm5 = vcmp.eq.s32.totalorder %v1948_v12, 1  ;;  %vm918_vm6 = vcmp.eq.s32.totalorder %v878_v40, 1 }
 0x18d   :  { %978 = vst [vmem:[%s2200_s4 + $0x98] sm:$0xff] %v946_v10  ;;  %v945_v20 = vsel %vm909_vm7, %v1974_v52, %v714_v15  ;;  %vm917_vm7 = vcmp.eq.s32.totalorder %v875_v53, 1 }
 0x18e   :  { %977 = vst [vmem:[%s2200_s4 + $0x90] sm:$0xff] %v945_v20  ;;  %v1175_v16 = vpop.f32.mrb[4].mxu1 }
 0x18f   :  { %v717_v34 = vsel %vm681_vm8, %v1969_v51, %v1175_v16  ;;  %v438_v35 = vpop.f32.mrb[5].mxu1  ;;  %vm689_vm8 = vcmp.eq.s32.totalorder %v1950_v5, 1 }
 0x190   :  { %v948_v38 = vsel %vm912_vm10, %v1974_v52, %v717_v34  ;;  %v716_v21 = vsel %vm680_vm9, %v1969_v51, %v438_v35  ;;  %vm688_vm9 = vcmp.eq.s32.totalorder %v1952_v56, 1  ;;  %vm920_vm10 = vcmp.eq.s32.totalorder %v884_v46, 1 }
 0x191   :  { %980 = vst [vmem:[%s2200_s4 + $0xa8] sm:$0xff] %v948_v38  ;;  %v947_v26 = vsel %vm911_vm11, %v1974_v52, %v716_v21  ;;  %vm919_vm11 = vcmp.eq.s32.totalorder %v881_v59, 1 }
 0x192   :  { %979 = vst [vmem:[%s2200_s4 + $0xa0] sm:$0xff] %v947_v26  ;;  %v1178_v27 = vpop.f32.mrb[6].mxu1 }
 0x193   :  { %v719_v39 = vsel %vm683_vm12, %v1969_v51, %v1178_v27  ;;  %v448_v22 = vpop.f32.mrb[7].mxu1  ;;  %vm691_vm12 = vcmp.eq.s32.totalorder %v1954_v17, 1 }
 0x194   :  { %v950_v41 = vsel %vm914_vm14, %v1974_v52, %v719_v39  ;;  %v718_v42 = vsel %vm682_vm13, %v1969_v51, %v448_v22  ;;  %vm690_vm13 = vcmp.eq.s32.totalorder %v1956_v2, 1  ;;  %vm922_vm14 = vcmp.eq.s32.totalorder %v890_v19, 1 }
 0x195   :  { %982 = vst [vmem:[%s2200_s4 + $0xb8] sm:$0xff] %v950_v41  ;;  %v949_v43 = vsel %vm913_vm15, %v1974_v52, %v718_v42  ;;  %vm921_vm15 = vcmp.eq.s32.totalorder %v887_v48, 1 }
 0x196   :  { %981 = vst [vmem:[%s2200_s4 + $0xb0] sm:$0xff] %v949_v43  ;;  %v1181_v44 = vpop.f32.mrb[8].mxu1 }
 0x197   :  { %v721_v58 = vsel %vm685_vm0, %v1969_v51, %v1181_v44  ;;  %v458_v28 = vpop.f32.mrb[9].mxu1 }
 0x198   :  { %v952_v29 = vsel %vm916_vm2, %v1974_v52, %v721_v58  ;;  %v720_v45 = vsel %vm684_vm1, %v1969_v51, %v458_v28 }
 0x199   :  { %984 = vst [vmem:[%s2200_s4 + $0xc8] sm:$0xff] %v952_v29  ;;  %v951_v57 = vsel %vm915_vm3, %v1974_v52, %v720_v45 }
 0x19a   :  { %983 = vst [vmem:[%s2200_s4 + $0xc0] sm:$0xff] %v951_v57  ;;  %v1184_v62 = vpop.f32.mrb[10].mxu1 }
 0x19b   :  { %v723_v0 = vsel %vm687_vm4, %v1969_v51, %v1184_v62  ;;  %v468_v36 = vpop.f32.mrb[11].mxu1 }
 0x19c   :  { %v954_v18 = vsel %vm918_vm6, %v1974_v52, %v723_v0  ;;  %v722_v37 = vsel %vm686_vm5, %v1969_v51, %v468_v36 }
 0x19d   :  { %986 = vst [vmem:[%s2200_s4 + $0xd8] sm:$0xff] %v954_v18  ;;  %v953_v11 = vsel %vm917_vm7, %v1974_v52, %v722_v37 }
 0x19e   :  { %985 = vst [vmem:[%s2200_s4 + $0xd0] sm:$0xff] %v953_v11  ;;  %v1187_v12 = vpop.f32.mrb[12].mxu1 }
 0x19f   :  { %v725_v47 = vsel %vm689_vm8, %v1969_v51, %v1187_v12  ;;  %v478_v50 = vpop.f32.mrb[13].mxu1 }
 0x1a0   :  { %v956_v24 = vsel %vm920_vm10, %v1974_v52, %v725_v47  ;;  %v724_v25 = vsel %vm688_vm9, %v1969_v51, %v478_v50 }
 0x1a1   :  { %988 = vst [vmem:[%s2200_s4 + $0xe8] sm:$0xff] %v956_v24  ;;  %v955_v5 = vsel %vm919_vm11, %v1974_v52, %v724_v25 }
 0x1a2   :  { %987 = vst [vmem:[%s2200_s4 + $0xe0] sm:$0xff] %v955_v5  ;;  %v1190_v56 = vpop.f32.mrb[14].mxu1 }
 0x1a3   :  { %v727_v30 = vsel %vm691_vm12, %v1969_v51, %v1190_v56  ;;  %v488_v49 = vpop.f32.mrb[15].mxu1 }
 0x1a4   :  { %v958_v55 = vsel %vm922_vm14, %v1974_v52, %v727_v30  ;;  %v726_v63 = vsel %vm690_vm13, %v1969_v51, %v488_v49 }
 0x1a5   :  { %990 = vst [vmem:[%s2200_s4 + $0xf8] sm:$0xff] %v958_v55  ;;  %v957_v17 = vsel %vm921_vm15, %v1974_v52, %v726_v63 }
 0x1a6   :  { %989 = vst [vmem:[%s2200_s4 + $0xf0] sm:$0xff] %v957_v17 }
 0x1a7   :  { %995 = vsyncpa [#allocation3], 1 }

</bundles_post_ra>
